<compile_context>
chip_gen: v6e
topology: v6e:2x2x1
jax: 0.10.0
libtpu: 0.0.40
codegen_flags: <defaults>
</compile_context>

<pallas_src>
import math
import numpy as np
import jax
import jax.numpy as jnp
from jax.experimental import pallas as pl
from jax.experimental.pallas import tpu as pltpu


def _round_up(x, m):
    return (x + m - 1) // m * m


# ----------------------------- Pallas kernel ------------------------------ #
def _fused_attn_kernel(x_ref, s_ref, bin_ref, qx_ref, wv_ref, o_ref, onehot_ref):
    """One (HW-tile, batch) grid step.

    x_ref      : (1, T*C, HWt)  temporal stack, sublane-packed
    s_ref      : (1, T, GG)     softmaxed pooled scores for this batch
    bin_ref    : (1, HWt)       int32 per-pixel grid-cell index (nearest upsample)
    qx_ref     : (1, C, HWt)    residual / query_x
    wv_ref     : (C, C)         value-conv weight, in SMEM
    o_ref      : (1, C, HWt)
    onehot_ref : (GG, HWt)      VMEM scratch, built once per HW tile
    """
    T = s_ref.shape[1]
    GG = s_ref.shape[2]
    C = qx_ref.shape[1]

    # Build the nearest-neighbour one-hot masks once per HW tile.  B is the
    # innermost ("arbitrary") grid axis, so the scratch persists across it and
    # the GG*HWt compare+cast is amortized over all batches.
    @pl.when(pl.program_id(1) == 0)
    def _():
        bins = bin_ref[...]                                      # (1, HWt) int32
        gg = jax.lax.broadcasted_iota(jnp.int32, (GG, 1), 0)     # (GG, 1)
        onehot_ref[...] = (bins == gg).astype(jnp.float32)       # (GG, HWt)

    onehot = onehot_ref[...]
    s = s_ref[0].astype(jnp.float32)                             # (T, GG)

    # Nearest-neighbour upsample of the pooled scores, exact f32 on the VPU:
    #   s_exp[t, p] = s[t, bin(p)] = sum_g s[t, g] * onehot[g, p]
    # (all-but-one term is exactly zero -> exact selection, no MXU precision risk).
    s_exp = s[:, 0:1] * onehot[0:1, :]
    for g in range(1, GG):
        s_exp = s_exp + s[:, g:g + 1] * onehot[g:g + 1, :]       # (T, HWt)

    # Weighted temporal accumulation (pure VPU).  The value conv is hoisted out
    # of the T loop since the per-pixel score scaling commutes with it.
    x = x_ref[0]                                                 # (T*C, HWt)
    acc = s_exp[0:1, :] * x[0:C, :].astype(jnp.float32)
    for t in range(1, T):
        acc = acc + s_exp[t:t + 1, :] * x[t * C:(t + 1) * C, :].astype(jnp.float32)

    # 1x1 value conv + residual.  For small C a handful of scalar-broadcast VPU
    # FMAs with the weight in SMEM beats a tiny MXU matmul; for production-sized
    # C (>= ~32) this would become
    #   v = jnp.dot(w_vmem[...], acc, preferred_element_type=jnp.float32).
    rows = []
    for co in range(C):
        r = wv_ref[co, 0] * acc[0:1, :]
        for ci in range(1, C):
            r = r + wv_ref[co, ci] * acc[ci:ci + 1, :]
        rows.append(r)
    v = jnp.concatenate(rows, axis=0)                            # (C, HWt)
    o_ref[0] = (qx_ref[0].astype(jnp.float32) + v).astype(o_ref.dtype)


# --------------------- tile sizing / VMEM accounting ----------------------- #
def _vmem_capacity_bytes():
    try:
        cap = getattr(pltpu.get_tpu_info(), "vmem_capacity_bytes", None)
        if cap:
            return int(cap)
    except Exception:
        pass
    return 64 << 20          # conservative fallback = v7x physical VMEM


def _per_lane_f32_bytes(t, c, gg):
    tc_pad = _round_up(t * c, 8)
    c_pad = _round_up(c, 8)
    gg_pad = _round_up(gg, 8)
    # double-buffered pipeline blocks (x, bin, qx, out) + onehot scratch
    # + in-kernel f32 temporaries (s_exp, acc, v, residual slab), incl. sublane padding.
    return 4 * (2 * (tc_pad + 8 + 2 * c_pad) + gg_pad + 4 * 8)


def _pick_hw_tile(hw, t, c, gg, vmem_cap):
    """Largest multiple-of-128 lane tile dividing HW, sized against the chip's
    VMEM capacity (generation-aware budget and lane target)."""
    if hw % 128 != 0:
        return hw                                    # full-extent block is always legal
    budget = min(vmem_cap * 5 // 8, 64 << 20)        # ~40 MiB on v7x, 64 MiB on v5e/v6e
    lane_target = 4096 if vmem_cap >= (96 << 20) else 2048
    per_lane = _per_lane_f32_bytes(t, c, gg)
    cap = max(128, min(lane_target, (budget // per_lane) // 128 * 128))
    tile = min(hw, cap)
    while hw % tile != 0:
        tile -= 128
    return tile


def fused_value_attention(x_packed, scores_pooled, bin_idx, qx_flat, w_value,
                          *, num_frames):
    """x_packed [B,T*C,HW], scores_pooled [B,T,GG] (softmaxed over T),
       bin_idx [1,HW] int32, qx_flat [B,C,HW], w_value [C,C]."""
    B, TC, HW = x_packed.shape
    T = num_frames
    C = qx_flat.shape[1]
    GG = scores_pooled.shape[-1]
    assert TC == T * C

    vmem_cap = _vmem_capacity_bytes()
    HWt = _pick_hw_tile(HW, T, C, GG, vmem_cap)
    n_tiles = HW // HWt

    blk_bytes = HWt * _per_lane_f32_bytes(T, C, GG)
    vmem_limit = int(min(max(blk_bytes + (4 << 20), 16 << 20),
                         min(vmem_cap * 5 // 8, 64 << 20)))

    return pl.pallas_call(
        _fused_attn_kernel,
        out_shape=jax.ShapeDtypeStruct((B, C, HW), x_packed.dtype),
        grid_spec=pltpu.PrefetchScalarGridSpec(
            num_scalar_prefetch=0,
            # HW tiles outermost ("parallel", megacore-shardable); B innermost
            # ("arbitrary") so the one-hot scratch is reused across batches.
            grid=(n_tiles, B),
            in_specs=[
                pl.BlockSpec((1, TC, HWt), lambda h, b: (b, 0, h)),
                pl.BlockSpec((1, T, GG), lambda h, b: (b, 0, 0)),
                pl.BlockSpec((1, HWt), lambda h, b: (0, h)),
                pl.BlockSpec((1, C, HWt), lambda h, b: (b, 0, h)),
                pl.BlockSpec(memory_space=pltpu.MemorySpace.SMEM),    # w_value scalars
            ],
            out_specs=pl.BlockSpec((1, C, HWt), lambda h, b: (b, 0, h)),
            scratch_shapes=[pltpu.VMEM((GG, HWt), jnp.float32)],
        ),
        compiler_params=pltpu.CompilerParams(
            dimension_semantics=("parallel", "arbitrary"),
            vmem_limit_bytes=vmem_limit),
    )(x_packed, scores_pooled, bin_idx, qx_flat, w_value)


# ------------------------------- JAX glue ---------------------------------- #
_HIGH = jax.lax.Precision.HIGHEST


def make_positional_encoding(d_model, max_seq_len=16):
    # Exact reproduction of the (quirky) PositionalEncoder.__init__:
    # cos term uses 10000 ** (2*(i+1)/d) -- intentional, matches the PyTorch module.
    pe = np.zeros((max_seq_len, d_model), dtype=np.float32)
    for pos in range(max_seq_len):
        for i in range(0, d_model, 2):
            pe[pos, i] = math.sin(pos / 10000 ** (2 * i / d_model))
            pe[pos, i + 1] = math.cos(pos / 10000 ** (2 * (i + 1) / d_model))
    return jnp.asarray(pe)  # [max_seq_len, d_model]


def adaptive_avg_pool(x, grid):
    # x [..., C, H, W] -> [..., C, gh, gw]; H % gh == 0 and W % gw == 0 assumed.
    gh, gw = grid
    *lead, C, H, W = x.shape
    x = x.reshape(*lead, C, gh, H // gh, gw, W // gw)
    return x.mean(axis=(-3, -1))


def kaiming_normal_fan_out(key, shape):
    # nn.init.kaiming_normal_(w, mode='fan_out', nonlinearity='relu'), 1x1 conv
    # weight squeezed to (out_ch, in_ch): std = sqrt(2 / out_ch)
    fan_out = shape[0]
    std = math.sqrt(2.0 / fan_out)
    return std * jax.random.normal(key, shape, dtype=jnp.float32)


def attention_tf_forward(x, query_x, params, grid=(4, 4)):
    """x: [B,T,C,H,W] f32, query_x: [B,C,H,W].  Upsample original_scale = (H, W)."""
    B, T, C, H, W = x.shape
    w_key, w_query = params["w_key"], params["w_query"]
    w_value, pe = params["w_value"], params["pe"]
    Cout = w_key.shape[0]
    gh, gw = grid

    # ---- pooled branch (tiny: gh*gw spatial points) -- plain JAX glue ----
    xp = adaptive_avg_pool(x, grid)                                   # [B,T,C,gh,gw]
    xp = xp * math.sqrt(C) + pe[:T][None, :, :, None, None]           # PositionalEncoder
    k = jnp.einsum("oc,btcij->btoij", w_key, xp, precision=_HIGH)     # key_conv (1x1)
    qp = adaptive_avg_pool(query_x, grid)                             # [B,C,gh,gw]
    q = jnp.einsum("oc,bcij->boij", w_query, qp, precision=_HIGH)     # query_conv (1x1)
    scores = jnp.sum(q[:, None] * k, axis=2) / math.sqrt(Cout)        # [B,T,gh,gw]
    scores = jax.nn.softmax(scores, axis=1)                           # softmax over T
    scores_pooled = scores.reshape(B, T, gh * gw)                     # [B,T,GG]

    # nn.Upsample(size=(H,W), mode='nearest'): src = floor(dst * in / out).
    # Only the per-pixel bin index is materialized (HW int32), not the full map.
    hi = (jnp.arange(H) * gh) // H
    wi = (jnp.arange(W) * gw) // W
    bin_idx = (hi[:, None] * gw + wi[None, :]).reshape(1, H * W).astype(jnp.int32)

    # ---- hot path: weighted temporal sum + value conv + residual (Pallas) ----
    x_packed = x.reshape(B, T * C, H * W)       # sublane-dense packing of the x stream
    qx_flat = query_x.reshape(B, C, H * W)
    out = fused_value_attention(x_packed, scores_pooled, bin_idx, qx_flat,
                                w_value, num_frames=T)
    return out.reshape(B, C, H, W)


def reference_forward(x, query_x, params, grid=(4, 4)):
    """Direct transcription of the PyTorch forward, pure jnp (for validation)."""
    B, T, C, H, W = x.shape
    w_key, w_query = params["w_key"], params["w_query"]
    w_value, pe = params["w_value"], params["pe"]
    Cout = w_key.shape[0]
    gh, gw = grid
    v = jnp.einsum("oc,btchw->btohw", w_value, x, precision=_HIGH)
    xp = adaptive_avg_pool(x, grid) * math.sqrt(C) + pe[:T][None, :, :, None, None]
    k = jnp.einsum("oc,btcij->btoij", w_key, xp, precision=_HIGH)
    q = jnp.einsum("oc,bcij->boij", w_query, adaptive_avg_pool(query_x, grid),
                   precision=_HIGH)
    scores = jax.nn.softmax(jnp.sum(q[:, None] * k, axis=2) / math.sqrt(Cout), axis=1)
    hi = (jnp.arange(H) * gh) // H
    wi = (jnp.arange(W) * gw) // W
    scores_up = scores[:, :, hi[:, None], wi[None, :]]                # [B,T,H,W]
    return jnp.sum(scores_up[:, :, None] * v, axis=1) + query_x


# --------------------------------- main ------------------------------------ #
if __name__ == "__main__":
    B, T, C, Cout, H, W = 2, 4, 4, 8, 16, 16
    grid = (4, 4)  # AdaptiveAvgPool2d grid; original_scale = (H, W) = (16, 16)

    key = jax.random.PRNGKey(0)
    kx, kq, k1, k2, k3 = jax.random.split(key, 5)
    x = jax.random.normal(kx, (B, T, C, H, W), dtype=jnp.float32)
    query_x = jax.random.normal(kq, (B, C, H, W), dtype=jnp.float32)

    params = {
        "w_key": kaiming_normal_fan_out(k1, (Cout, C)),    # key_conv.weight  [Cout,C,1,1]
        "w_query": kaiming_normal_fan_out(k2, (Cout, C)),  # query_conv.weight
        "w_value": kaiming_normal_fan_out(k3, (C, C)),     # value_conv.weight [C,C,1,1]
        "pe": make_positional_encoding(C, max_seq_len=16),
    }

    out = attention_tf_forward(x, query_x, params, grid=grid)
    jax.block_until_ready(out)
    assert out.shape == (B, C, H, W)

    # All kernel math is exact f32 (VPU select/FMA only, no reduced-precision matmul),
    # so the check is tight (review correctness concern: was 2e-2, now 1e-5).
    ref = reference_forward(x, query_x, params, grid=grid)
    np.testing.assert_allclose(np.asarray(out), np.asarray(ref), rtol=1e-5, atol=1e-5)
    print("KERNEL_OK")
</pallas_src>

<mosaic_0001>
module attributes {stable_mosaic.version = 11 : i64} {
  func.func @_fused_attn_kernel(%arg0: i32, %arg1: i32, %arg2: memref<1x16x256xf32, #tpu.memory_space<vmem>>, %arg3: memref<1x4x16xf32, #tpu.memory_space<vmem>>, %arg4: memref<1x256xi32, #tpu.memory_space<vmem>>, %arg5: memref<1x4x256xf32, #tpu.memory_space<vmem>>, %arg6: memref<4x4xf32, #tpu.memory_space<smem>>, %arg7: memref<1x4x256xf32, #tpu.memory_space<vmem>>, %arg8: memref<16x256xf32, #tpu.memory_space<vmem>>) attributes {dimension_semantics = [#tpu.dimension_semantics<parallel>, #tpu.dimension_semantics<arbitrary>], iteration_bounds = array<i64: 1, 2>, scalar_prefetch = 0 : i64, scratch_operands = 1 : i64, tpu.core_type = #tpu.core_type<tc>, window_params = [{transform_indices = @transform_0, window_bounds = array<i64: 1, 16, 256>}, {transform_indices = @transform_1, window_bounds = array<i64: 1, 4, 16>}, {transform_indices = @transform_2, window_bounds = array<i64: 1, 256>}, {transform_indices = @transform_3, window_bounds = array<i64: 1, 4, 256>}, {transform_indices = @transform_4, window_bounds = array<i64: 4, 4>}, {transform_indices = @transform_5, window_bounds = array<i64: 1, 4, 256>}]} {
    %c0_i32 = arith.constant 0 : i32
    %0 = arith.cmpi eq, %arg1, %c0_i32 : i32
    %1 = arith.extui %0 : i1 to i32
    %c0_i32_0 = arith.constant 0 : i32
    %2 = arith.cmpi ne, %1, %c0_i32_0 : i32
    scf.if %2 {
      %c0_43 = arith.constant 0 : index
      %c0_44 = arith.constant 0 : index
      %205 = vector.load %arg4[%c0_43, %c0_44] : memref<1x256xi32, #tpu.memory_space<vmem>>, vector<1x256xi32>
      %206 = tpu.iota {dimensions = array<i32: 0>} : vector<16x1xi32>
      %207 = vector.broadcast %205 : vector<1x256xi32> to vector<16x256xi32>
      %208 = vector.broadcast %206 : vector<16x1xi32> to vector<16x256xi32>
      %209 = arith.cmpi eq, %207, %208 : vector<16x256xi32>
      %210 = arith.extui %209 : vector<16x256xi1> to vector<16x256xi32>
      %211 = arith.sitofp %210 : vector<16x256xi32> to vector<16x256xf32>
      %c0_45 = arith.constant 0 : index
      %c0_46 = arith.constant 0 : index
      %212 = vector.load %arg8[%c0_45, %c0_46] : memref<16x256xf32, #tpu.memory_space<vmem>>, vector<16x256xf32>
      tpu.vector_store %arg8[%c0_45, %c0_46], %211 {strides = array<i32>} : memref<16x256xf32, #tpu.memory_space<vmem>>, vector<16x256xf32>,
    } else {
    }
    %c0 = arith.constant 0 : index
    %c0_1 = arith.constant 0 : index
    %3 = vector.load %arg8[%c0, %c0_1] : memref<16x256xf32, #tpu.memory_space<vmem>>, vector<16x256xf32>
    %c0_2 = arith.constant 0 : index
    %c0_3 = arith.constant 0 : index
    %c0_4 = arith.constant 0 : index
    %4 = vector.load %arg3[%c0_2, %c0_3, %c0_4] : memref<1x4x16xf32, #tpu.memory_space<vmem>>, vector<1x4x16xf32>
    %5 = vector.shape_cast %4 : vector<1x4x16xf32> to vector<4x16xf32>
    %6 = vector.extract_strided_slice %5 {offsets = [0, 0], sizes = [4, 1], strides = [1, 1]} : vector<4x16xf32> to vector<4x1xf32>
    %7 = vector.extract_strided_slice %3 {offsets = [0, 0], sizes = [1, 256], strides = [1, 1]} : vector<16x256xf32> to vector<1x256xf32>
    %8 = vector.broadcast %6 : vector<4x1xf32> to vector<4x256xf32>
    %9 = vector.broadcast %7 : vector<1x256xf32> to vector<4x256xf32>
    %10 = arith.mulf %8, %9 : vector<4x256xf32>
    %11 = vector.extract_strided_slice %5 {offsets = [0, 1], sizes = [4, 1], strides = [1, 1]} : vector<4x16xf32> to vector<4x1xf32>
    %12 = vector.extract_strided_slice %3 {offsets = [1, 0], sizes = [1, 256], strides = [1, 1]} : vector<16x256xf32> to vector<1x256xf32>
    %13 = vector.broadcast %11 : vector<4x1xf32> to vector<4x256xf32>
    %14 = vector.broadcast %12 : vector<1x256xf32> to vector<4x256xf32>
    %15 = arith.mulf %13, %14 : vector<4x256xf32>
    %16 = arith.addf %10, %15 : vector<4x256xf32>
    %17 = vector.extract_strided_slice %5 {offsets = [0, 2], sizes = [4, 1], strides = [1, 1]} : vector<4x16xf32> to vector<4x1xf32>
    %18 = vector.extract_strided_slice %3 {offsets = [2, 0], sizes = [1, 256], strides = [1, 1]} : vector<16x256xf32> to vector<1x256xf32>
    %19 = vector.broadcast %17 : vector<4x1xf32> to vector<4x256xf32>
    %20 = vector.broadcast %18 : vector<1x256xf32> to vector<4x256xf32>
    %21 = arith.mulf %19, %20 : vector<4x256xf32>
    %22 = arith.addf %16, %21 : vector<4x256xf32>
    %23 = vector.extract_strided_slice %5 {offsets = [0, 3], sizes = [4, 1], strides = [1, 1]} : vector<4x16xf32> to vector<4x1xf32>
    %24 = vector.extract_strided_slice %3 {offsets = [3, 0], sizes = [1, 256], strides = [1, 1]} : vector<16x256xf32> to vector<1x256xf32>
    %25 = vector.broadcast %23 : vector<4x1xf32> to vector<4x256xf32>
    %26 = vector.broadcast %24 : vector<1x256xf32> to vector<4x256xf32>
    %27 = arith.mulf %25, %26 : vector<4x256xf32>
    %28 = arith.addf %22, %27 : vector<4x256xf32>
    %29 = vector.extract_strided_slice %5 {offsets = [0, 4], sizes = [4, 1], strides = [1, 1]} : vector<4x16xf32> to vector<4x1xf32>
    %30 = vector.extract_strided_slice %3 {offsets = [4, 0], sizes = [1, 256], strides = [1, 1]} : vector<16x256xf32> to vector<1x256xf32>
    %31 = vector.broadcast %29 : vector<4x1xf32> to vector<4x256xf32>
    %32 = vector.broadcast %30 : vector<1x256xf32> to vector<4x256xf32>
    %33 = arith.mulf %31, %32 : vector<4x256xf32>
    %34 = arith.addf %28, %33 : vector<4x256xf32>
    %35 = vector.extract_strided_slice %5 {offsets = [0, 5], sizes = [4, 1], strides = [1, 1]} : vector<4x16xf32> to vector<4x1xf32>
    %36 = vector.extract_strided_slice %3 {offsets = [5, 0], sizes = [1, 256], strides = [1, 1]} : vector<16x256xf32> to vector<1x256xf32>
    %37 = vector.broadcast %35 : vector<4x1xf32> to vector<4x256xf32>
    %38 = vector.broadcast %36 : vector<1x256xf32> to vector<4x256xf32>
    %39 = arith.mulf %37, %38 : vector<4x256xf32>
    %40 = arith.addf %34, %39 : vector<4x256xf32>
    %41 = vector.extract_strided_slice %5 {offsets = [0, 6], sizes = [4, 1], strides = [1, 1]} : vector<4x16xf32> to vector<4x1xf32>
    %42 = vector.extract_strided_slice %3 {offsets = [6, 0], sizes = [1, 256], strides = [1, 1]} : vector<16x256xf32> to vector<1x256xf32>
    %43 = vector.broadcast %41 : vector<4x1xf32> to vector<4x256xf32>
    %44 = vector.broadcast %42 : vector<1x256xf32> to vector<4x256xf32>
    %45 = arith.mulf %43, %44 : vector<4x256xf32>
    %46 = arith.addf %40, %45 : vector<4x256xf32>
    %47 = vector.extract_strided_slice %5 {offsets = [0, 7], sizes = [4, 1], strides = [1, 1]} : vector<4x16xf32> to vector<4x1xf32>
    %48 = vector.extract_strided_slice %3 {offsets = [7, 0], sizes = [1, 256], strides = [1, 1]} : vector<16x256xf32> to vector<1x256xf32>
    %49 = vector.broadcast %47 : vector<4x1xf32> to vector<4x256xf32>
    %50 = vector.broadcast %48 : vector<1x256xf32> to vector<4x256xf32>
    %51 = arith.mulf %49, %50 : vector<4x256xf32>
    %52 = arith.addf %46, %51 : vector<4x256xf32>
    %53 = vector.extract_strided_slice %5 {offsets = [0, 8], sizes = [4, 1], strides = [1, 1]} : vector<4x16xf32> to vector<4x1xf32>
    %54 = vector.extract_strided_slice %3 {offsets = [8, 0], sizes = [1, 256], strides = [1, 1]} : vector<16x256xf32> to vector<1x256xf32>
    %55 = vector.broadcast %53 : vector<4x1xf32> to vector<4x256xf32>
    %56 = vector.broadcast %54 : vector<1x256xf32> to vector<4x256xf32>
    %57 = arith.mulf %55, %56 : vector<4x256xf32>
    %58 = arith.addf %52, %57 : vector<4x256xf32>
    %59 = vector.extract_strided_slice %5 {offsets = [0, 9], sizes = [4, 1], strides = [1, 1]} : vector<4x16xf32> to vector<4x1xf32>
    %60 = vector.extract_strided_slice %3 {offsets = [9, 0], sizes = [1, 256], strides = [1, 1]} : vector<16x256xf32> to vector<1x256xf32>
    %61 = vector.broadcast %59 : vector<4x1xf32> to vector<4x256xf32>
    %62 = vector.broadcast %60 : vector<1x256xf32> to vector<4x256xf32>
    %63 = arith.mulf %61, %62 : vector<4x256xf32>
    %64 = arith.addf %58, %63 : vector<4x256xf32>
    %65 = vector.extract_strided_slice %5 {offsets = [0, 10], sizes = [4, 1], strides = [1, 1]} : vector<4x16xf32> to vector<4x1xf32>
    %66 = vector.extract_strided_slice %3 {offsets = [10, 0], sizes = [1, 256], strides = [1, 1]} : vector<16x256xf32> to vector<1x256xf32>
    %67 = vector.broadcast %65 : vector<4x1xf32> to vector<4x256xf32>
    %68 = vector.broadcast %66 : vector<1x256xf32> to vector<4x256xf32>
    %69 = arith.mulf %67, %68 : vector<4x256xf32>
    %70 = arith.addf %64, %69 : vector<4x256xf32>
    %71 = vector.extract_strided_slice %5 {offsets = [0, 11], sizes = [4, 1], strides = [1, 1]} : vector<4x16xf32> to vector<4x1xf32>
    %72 = vector.extract_strided_slice %3 {offsets = [11, 0], sizes = [1, 256], strides = [1, 1]} : vector<16x256xf32> to vector<1x256xf32>
    %73 = vector.broadcast %71 : vector<4x1xf32> to vector<4x256xf32>
    %74 = vector.broadcast %72 : vector<1x256xf32> to vector<4x256xf32>
    %75 = arith.mulf %73, %74 : vector<4x256xf32>
    %76 = arith.addf %70, %75 : vector<4x256xf32>
    %77 = vector.extract_strided_slice %5 {offsets = [0, 12], sizes = [4, 1], strides = [1, 1]} : vector<4x16xf32> to vector<4x1xf32>
    %78 = vector.extract_strided_slice %3 {offsets = [12, 0], sizes = [1, 256], strides = [1, 1]} : vector<16x256xf32> to vector<1x256xf32>
    %79 = vector.broadcast %77 : vector<4x1xf32> to vector<4x256xf32>
    %80 = vector.broadcast %78 : vector<1x256xf32> to vector<4x256xf32>
    %81 = arith.mulf %79, %80 : vector<4x256xf32>
    %82 = arith.addf %76, %81 : vector<4x256xf32>
    %83 = vector.extract_strided_slice %5 {offsets = [0, 13], sizes = [4, 1], strides = [1, 1]} : vector<4x16xf32> to vector<4x1xf32>
    %84 = vector.extract_strided_slice %3 {offsets = [13, 0], sizes = [1, 256], strides = [1, 1]} : vector<16x256xf32> to vector<1x256xf32>
    %85 = vector.broadcast %83 : vector<4x1xf32> to vector<4x256xf32>
    %86 = vector.broadcast %84 : vector<1x256xf32> to vector<4x256xf32>
    %87 = arith.mulf %85, %86 : vector<4x256xf32>
    %88 = arith.addf %82, %87 : vector<4x256xf32>
    %89 = vector.extract_strided_slice %5 {offsets = [0, 14], sizes = [4, 1], strides = [1, 1]} : vector<4x16xf32> to vector<4x1xf32>
    %90 = vector.extract_strided_slice %3 {offsets = [14, 0], sizes = [1, 256], strides = [1, 1]} : vector<16x256xf32> to vector<1x256xf32>
    %91 = vector.broadcast %89 : vector<4x1xf32> to vector<4x256xf32>
    %92 = vector.broadcast %90 : vector<1x256xf32> to vector<4x256xf32>
    %93 = arith.mulf %91, %92 : vector<4x256xf32>
    %94 = arith.addf %88, %93 : vector<4x256xf32>
    %95 = vector.extract_strided_slice %5 {offsets = [0, 15], sizes = [4, 1], strides = [1, 1]} : vector<4x16xf32> to vector<4x1xf32>
    %96 = vector.extract_strided_slice %3 {offsets = [15, 0], sizes = [1, 256], strides = [1, 1]} : vector<16x256xf32> to vector<1x256xf32>
    %97 = vector.broadcast %95 : vector<4x1xf32> to vector<4x256xf32>
    %98 = vector.broadcast %96 : vector<1x256xf32> to vector<4x256xf32>
    %99 = arith.mulf %97, %98 : vector<4x256xf32>
    %100 = arith.addf %94, %99 : vector<4x256xf32>
    %c0_5 = arith.constant 0 : index
    %c0_6 = arith.constant 0 : index
    %c0_7 = arith.constant 0 : index
    %101 = vector.load %arg2[%c0_5, %c0_6, %c0_7] : memref<1x16x256xf32, #tpu.memory_space<vmem>>, vector<1x16x256xf32>
    %102 = vector.shape_cast %101 : vector<1x16x256xf32> to vector<16x256xf32>
    %103 = vector.extract_strided_slice %100 {offsets = [0, 0], sizes = [1, 256], strides = [1, 1]} : vector<4x256xf32> to vector<1x256xf32>
    %104 = vector.extract_strided_slice %102 {offsets = [0, 0], sizes = [4, 256], strides = [1, 1]} : vector<16x256xf32> to vector<4x256xf32>
    %105 = vector.broadcast %103 : vector<1x256xf32> to vector<4x256xf32>
    %106 = arith.mulf %105, %104 : vector<4x256xf32>
    %107 = vector.extract_strided_slice %100 {offsets = [1, 0], sizes = [1, 256], strides = [1, 1]} : vector<4x256xf32> to vector<1x256xf32>
    %108 = vector.extract_strided_slice %102 {offsets = [4, 0], sizes = [4, 256], strides = [1, 1]} : vector<16x256xf32> to vector<4x256xf32>
    %109 = vector.broadcast %107 : vector<1x256xf32> to vector<4x256xf32>
    %110 = arith.mulf %109, %108 : vector<4x256xf32>
    %111 = arith.addf %106, %110 : vector<4x256xf32>
    %112 = vector.extract_strided_slice %100 {offsets = [2, 0], sizes = [1, 256], strides = [1, 1]} : vector<4x256xf32> to vector<1x256xf32>
    %113 = vector.extract_strided_slice %102 {offsets = [8, 0], sizes = [4, 256], strides = [1, 1]} : vector<16x256xf32> to vector<4x256xf32>
    %114 = vector.broadcast %112 : vector<1x256xf32> to vector<4x256xf32>
    %115 = arith.mulf %114, %113 : vector<4x256xf32>
    %116 = arith.addf %111, %115 : vector<4x256xf32>
    %117 = vector.extract_strided_slice %100 {offsets = [3, 0], sizes = [1, 256], strides = [1, 1]} : vector<4x256xf32> to vector<1x256xf32>
    %118 = vector.extract_strided_slice %102 {offsets = [12, 0], sizes = [4, 256], strides = [1, 1]} : vector<16x256xf32> to vector<4x256xf32>
    %119 = vector.broadcast %117 : vector<1x256xf32> to vector<4x256xf32>
    %120 = arith.mulf %119, %118 : vector<4x256xf32>
    %121 = arith.addf %116, %120 : vector<4x256xf32>
    %c0_8 = arith.constant 0 : index
    %c0_9 = arith.constant 0 : index
    %122 = memref.load %arg6[%c0_8, %c0_9] : memref<4x4xf32, #tpu.memory_space<smem>>
    %123 = vector.extract_strided_slice %121 {offsets = [0, 0], sizes = [1, 256], strides = [1, 1]} : vector<4x256xf32> to vector<1x256xf32>
    %124 = vector.broadcast %122 : f32 to vector<1x256xf32>
    %125 = arith.mulf %124, %123 : vector<1x256xf32>
    %c0_10 = arith.constant 0 : index
    %c1 = arith.constant 1 : index
    %126 = memref.load %arg6[%c0_10, %c1] : memref<4x4xf32, #tpu.memory_space<smem>>
    %127 = vector.extract_strided_slice %121 {offsets = [1, 0], sizes = [1, 256], strides = [1, 1]} : vector<4x256xf32> to vector<1x256xf32>
    %128 = vector.broadcast %126 : f32 to vector<1x256xf32>
    %129 = arith.mulf %128, %127 : vector<1x256xf32>
    %130 = arith.addf %125, %129 : vector<1x256xf32>
    %c0_11 = arith.constant 0 : index
    %c2 = arith.constant 2 : index
    %131 = memref.load %arg6[%c0_11, %c2] : memref<4x4xf32, #tpu.memory_space<smem>>
    %132 = vector.extract_strided_slice %121 {offsets = [2, 0], sizes = [1, 256], strides = [1, 1]} : vector<4x256xf32> to vector<1x256xf32>
    %133 = vector.broadcast %131 : f32 to vector<1x256xf32>
    %134 = arith.mulf %133, %132 : vector<1x256xf32>
    %135 = arith.addf %130, %134 : vector<1x256xf32>
    %c0_12 = arith.constant 0 : index
    %c3 = arith.constant 3 : index
    %136 = memref.load %arg6[%c0_12, %c3] : memref<4x4xf32, #tpu.memory_space<smem>>
    %137 = vector.extract_strided_slice %121 {offsets = [3, 0], sizes = [1, 256], strides = [1, 1]} : vector<4x256xf32> to vector<1x256xf32>
    %138 = vector.broadcast %136 : f32 to vector<1x256xf32>
    %139 = arith.mulf %138, %137 : vector<1x256xf32>
    %140 = arith.addf %135, %139 : vector<1x256xf32>
    %c1_13 = arith.constant 1 : index
    %c0_14 = arith.constant 0 : index
    %141 = memref.load %arg6[%c1_13, %c0_14] : memref<4x4xf32, #tpu.memory_space<smem>>
    %142 = vector.extract_strided_slice %121 {offsets = [0, 0], sizes = [1, 256], strides = [1, 1]} : vector<4x256xf32> to vector<1x256xf32>
    %143 = vector.broadcast %141 : f32 to vector<1x256xf32>
    %144 = arith.mulf %143, %142 : vector<1x256xf32>
    %c1_15 = arith.constant 1 : index
    %c1_16 = arith.constant 1 : index
    %145 = memref.load %arg6[%c1_15, %c1_16] : memref<4x4xf32, #tpu.memory_space<smem>>
    %146 = vector.extract_strided_slice %121 {offsets = [1, 0], sizes = [1, 256], strides = [1, 1]} : vector<4x256xf32> to vector<1x256xf32>
    %147 = vector.broadcast %145 : f32 to vector<1x256xf32>
    %148 = arith.mulf %147, %146 : vector<1x256xf32>
    %149 = arith.addf %144, %148 : vector<1x256xf32>
    %c1_17 = arith.constant 1 : index
    %c2_18 = arith.constant 2 : index
    %150 = memref.load %arg6[%c1_17, %c2_18] : memref<4x4xf32, #tpu.memory_space<smem>>
    %151 = vector.extract_strided_slice %121 {offsets = [2, 0], sizes = [1, 256], strides = [1, 1]} : vector<4x256xf32> to vector<1x256xf32>
    %152 = vector.broadcast %150 : f32 to vector<1x256xf32>
    %153 = arith.mulf %152, %151 : vector<1x256xf32>
    %154 = arith.addf %149, %153 : vector<1x256xf32>
    %c1_19 = arith.constant 1 : index
    %c3_20 = arith.constant 3 : index
    %155 = memref.load %arg6[%c1_19, %c3_20] : memref<4x4xf32, #tpu.memory_space<smem>>
    %156 = vector.extract_strided_slice %121 {offsets = [3, 0], sizes = [1, 256], strides = [1, 1]} : vector<4x256xf32> to vector<1x256xf32>
    %157 = vector.broadcast %155 : f32 to vector<1x256xf32>
    %158 = arith.mulf %157, %156 : vector<1x256xf32>
    %159 = arith.addf %154, %158 : vector<1x256xf32>
    %c2_21 = arith.constant 2 : index
    %c0_22 = arith.constant 0 : index
    %160 = memref.load %arg6[%c2_21, %c0_22] : memref<4x4xf32, #tpu.memory_space<smem>>
    %161 = vector.extract_strided_slice %121 {offsets = [0, 0], sizes = [1, 256], strides = [1, 1]} : vector<4x256xf32> to vector<1x256xf32>
    %162 = vector.broadcast %160 : f32 to vector<1x256xf32>
    %163 = arith.mulf %162, %161 : vector<1x256xf32>
    %c2_23 = arith.constant 2 : index
    %c1_24 = arith.constant 1 : index
    %164 = memref.load %arg6[%c2_23, %c1_24] : memref<4x4xf32, #tpu.memory_space<smem>>
    %165 = vector.extract_strided_slice %121 {offsets = [1, 0], sizes = [1, 256], strides = [1, 1]} : vector<4x256xf32> to vector<1x256xf32>
    %166 = vector.broadcast %164 : f32 to vector<1x256xf32>
    %167 = arith.mulf %166, %165 : vector<1x256xf32>
    %168 = arith.addf %163, %167 : vector<1x256xf32>
    %c2_25 = arith.constant 2 : index
    %c2_26 = arith.constant 2 : index
    %169 = memref.load %arg6[%c2_25, %c2_26] : memref<4x4xf32, #tpu.memory_space<smem>>
    %170 = vector.extract_strided_slice %121 {offsets = [2, 0], sizes = [1, 256], strides = [1, 1]} : vector<4x256xf32> to vector<1x256xf32>
    %171 = vector.broadcast %169 : f32 to vector<1x256xf32>
    %172 = arith.mulf %171, %170 : vector<1x256xf32>
    %173 = arith.addf %168, %172 : vector<1x256xf32>
    %c2_27 = arith.constant 2 : index
    %c3_28 = arith.constant 3 : index
    %174 = memref.load %arg6[%c2_27, %c3_28] : memref<4x4xf32, #tpu.memory_space<smem>>
    %175 = vector.extract_strided_slice %121 {offsets = [3, 0], sizes = [1, 256], strides = [1, 1]} : vector<4x256xf32> to vector<1x256xf32>
    %176 = vector.broadcast %174 : f32 to vector<1x256xf32>
    %177 = arith.mulf %176, %175 : vector<1x256xf32>
    %178 = arith.addf %173, %177 : vector<1x256xf32>
    %c3_29 = arith.constant 3 : index
    %c0_30 = arith.constant 0 : index
    %179 = memref.load %arg6[%c3_29, %c0_30] : memref<4x4xf32, #tpu.memory_space<smem>>
    %180 = vector.extract_strided_slice %121 {offsets = [0, 0], sizes = [1, 256], strides = [1, 1]} : vector<4x256xf32> to vector<1x256xf32>
    %181 = vector.broadcast %179 : f32 to vector<1x256xf32>
    %182 = arith.mulf %181, %180 : vector<1x256xf32>
    %c3_31 = arith.constant 3 : index
    %c1_32 = arith.constant 1 : index
    %183 = memref.load %arg6[%c3_31, %c1_32] : memref<4x4xf32, #tpu.memory_space<smem>>
    %184 = vector.extract_strided_slice %121 {offsets = [1, 0], sizes = [1, 256], strides = [1, 1]} : vector<4x256xf32> to vector<1x256xf32>
    %185 = vector.broadcast %183 : f32 to vector<1x256xf32>
    %186 = arith.mulf %185, %184 : vector<1x256xf32>
    %187 = arith.addf %182, %186 : vector<1x256xf32>
    %c3_33 = arith.constant 3 : index
    %c2_34 = arith.constant 2 : index
    %188 = memref.load %arg6[%c3_33, %c2_34] : memref<4x4xf32, #tpu.memory_space<smem>>
    %189 = vector.extract_strided_slice %121 {offsets = [2, 0], sizes = [1, 256], strides = [1, 1]} : vector<4x256xf32> to vector<1x256xf32>
    %190 = vector.broadcast %188 : f32 to vector<1x256xf32>
    %191 = arith.mulf %190, %189 : vector<1x256xf32>
    %192 = arith.addf %187, %191 : vector<1x256xf32>
    %c3_35 = arith.constant 3 : index
    %c3_36 = arith.constant 3 : index
    %193 = memref.load %arg6[%c3_35, %c3_36] : memref<4x4xf32, #tpu.memory_space<smem>>
    %194 = vector.extract_strided_slice %121 {offsets = [3, 0], sizes = [1, 256], strides = [1, 1]} : vector<4x256xf32> to vector<1x256xf32>
    %195 = vector.broadcast %193 : f32 to vector<1x256xf32>
    %196 = arith.mulf %195, %194 : vector<1x256xf32>
    %197 = arith.addf %192, %196 : vector<1x256xf32>
    %198 = tpu.concatenate %140, %159, %178, %197 in 0 : vector<1x256xf32>, vector<1x256xf32>, vector<1x256xf32>, vector<1x256xf32> -> vector<4x256xf32>
    %c0_37 = arith.constant 0 : index
    %c0_38 = arith.constant 0 : index
    %c0_39 = arith.constant 0 : index
    %199 = vector.load %arg5[%c0_37, %c0_38, %c0_39] : memref<1x4x256xf32, #tpu.memory_space<vmem>>, vector<1x4x256xf32>
    %200 = vector.shape_cast %199 : vector<1x4x256xf32> to vector<4x256xf32>
    %201 = arith.addf %200, %198 : vector<4x256xf32>
    %c0_40 = arith.constant 0 : index
    %c0_41 = arith.constant 0 : index
    %c0_42 = arith.constant 0 : index
    %202 = vector.load %arg7[%c0_40, %c0_41, %c0_42] : memref<1x4x256xf32, #tpu.memory_space<vmem>>, vector<1x4x256xf32>
    %203 = vector.shape_cast %202 : vector<1x4x256xf32> to vector<4x256xf32>
    %204 = vector.shape_cast %201 : vector<4x256xf32> to vector<1x4x256xf32>
    tpu.vector_store %arg7[%c0_40, %c0_41, %c0_42], %204 {strides = array<i32>} : memref<1x4x256xf32, #tpu.memory_space<vmem>>, vector<1x4x256xf32>,
    return
  }
  func.func @transform_0(%arg0: i32, %arg1: i32) -> (i32, i32, i32) {
    %c0_i32 = arith.constant 0 : i32
    %c0_i32_0 = arith.constant 0 : i32
    return %arg1, %c0_i32, %arg0 : i32, i32, i32
  }
  func.func @transform_1(%arg0: i32, %arg1: i32) -> (i32, i32, i32) {
    %c0_i32 = arith.constant 0 : i32
    %c0_i32_0 = arith.constant 0 : i32
    %c0_i32_1 = arith.constant 0 : i32
    return %arg1, %c0_i32, %c0_i32_0 : i32, i32, i32
  }
  func.func @transform_2(%arg0: i32, %arg1: i32) -> (i32, i32) {
    %c0_i32 = arith.constant 0 : i32
    %c0_i32_0 = arith.constant 0 : i32
    return %c0_i32, %arg0 : i32, i32
  }
  func.func @transform_3(%arg0: i32, %arg1: i32) -> (i32, i32, i32) {
    %c0_i32 = arith.constant 0 : i32
    %c0_i32_0 = arith.constant 0 : i32
    return %arg1, %c0_i32, %arg0 : i32, i32, i32
  }
  func.func @transform_4(%arg0: i32, %arg1: i32) -> (i32, i32) {
    %c0_i32 = arith.constant 0 : i32
    %c0_i32_0 = arith.constant 0 : i32
    %c0_i32_1 = arith.constant 0 : i32
    return %c0_i32, %c0_i32_0 : i32, i32
  }
  func.func @transform_5(%arg0: i32, %arg1: i32) -> (i32, i32, i32) {
    %c0_i32 = arith.constant 0 : i32
    %c0_i32_0 = arith.constant 0 : i32
    return %arg1, %c0_i32, %arg0 : i32, i32, i32
  }
}

</mosaic_0001>

<bundles_post_ra>
// kernel: tpu_custom_call.1
= control target key start
LH: loop header
LB: loop body
LE: loop exit
PB: predicated region body
PF: predicated region fallthrough
CT: control target
= control target key end

     0   :  { %s1923_s0 = inlined_call_operand.hbm [shape: f32[2,16,256], index: 0, kind: input, shape index: {}]   ;;  %s1924_s1 = inlined_call_operand.hbm [shape: f32[2,4,16], index: 1, kind: input, shape index: {}]   ;;  %s1925_s2 = inlined_call_operand.vmem [shape: s32[1,256], index: 2, kind: input, shape index: {}]   ;;  %s1926_s3 = inlined_call_operand.hbm [shape: f32[2,4,256], index: 3, kind: input, shape index: {}]   ;;  %s1927_s4 = inlined_call_operand.vmem [shape: f32[4,4], index: 4, kind: input, shape index: {}]   ;;  %s1928_s5 = inlined_call_operand.hbm [shape: f32[2,4,256], index: 5, kind: output, shape index: {}]  }
   0x1   :  { %1933 = sst [smem:[#allocation19_spill]] %s1923_s0 }
   0x2   :  { %1934 = sst [smem:[#allocation20_spill]] %s1924_s1 }
   0x3   :  { %1935 = sst [smem:[#allocation21_spill]] %s1927_s4 }
   0x4   :  { %10 = vsyncpa [#allocation4], 0 }
   0x5   :  { %12 = vsyncpa [#allocation4 + $0x1], 0 }
   0x6   :  { %13 = vsyncpa [#allocation8], 0 }
   0x7   :  { %15 = vsyncpa [#allocation8 + $0x1], 0 }
   0x8   :  { %16 = vsyncpa [#allocation6], 0 }
   0x9   :  { %17 = vsyncpa [#allocation5], 0 }
   0xa   :  { %19 = vsyncpa [#allocation5 + $0x1], 0  ;;  %s1502_s18 = smov 0   ;;  %s1504_s19 = smov 0  }
   0xb   :  { %s1506_s20 = smov 0   ;;  %s1508_s21 = smov 0  }
   0xc   :  { %s1510_s22 = smov 0   ;;  %s1512_s23 = smov 0  }
   0xd LB: > { %1936 = sst [smem:[#allocation16_spill]] %s1434_s20  ;;  %s34_s24 = sadd.s32 1, %s1442_s22  ;;  %s1446_s23 = sphi %s1512_s23, %s25_s23   ;;  %s1442_s22 = sphi %s1510_s22, %s1959_s22   ;;  %s1438_s21 = sphi %s1508_s21, %s1958_s21   ;;  %s1434_s20 = sphi %s1506_s20, %s1954_s20   ;;  %s1430_s19 = sphi %s1504_s19, %s1957_s19   ;;  %s1426_s18 = sphi %s1502_s18, %s1956_s18  }
   0xe   : > { %s46_s25 = sadd.s32 1, %s1434_s20  ;;  %p35_p0 = scmp.ge.s32.totalorder %s34_s24, 2 }
   0xf   : > { %p53_p1 = scmp.ne.s32.totalorder %s1434_s20, %s1430_s19  ;;  %p54_p2 = scmp.eq.s32.totalorder %s1446_s23, 0 }
  0x10   : > { %s1961_s24 = smov (%p35_p0, %s34_s24), 0  ;;  %p1171_p5 = scmp.lt.s32.totalorder %s1446_s23, 2 }
  0x11   : > { %1937 = sst [smem:[#allocation17_spill]] %s1961_s24  ;;  %p55_p4 = por %p54_p2, %p53_p1 }
  0x12   : > { %s41_s26 = ssub.s32 %s1442_s22, %s1961_s24  ;;  %s1547_s27 = sand.u32 1, %s1434_s20  }
  0x13   : > { %p44_p6 = scmp.eq.s32.totalorder %s41_s26, 0  ;;  %p1549_p7 = pnand %p1171_p5, %p55_p4 }
  0x14   : > { %s254_s29 = sand.u32 1, %s1446_s23   ;;  %s1101_s30 = sshll.u32 %s1547_s27, 2 }
  0x15   : > { %s1556_s6 = scalar_select %p44_p6, %s1434_s20, %s46_s25  }
  0x16   : > { %s1102_s7 = sshll.u32 %s1442_s22, 6  ;;  %s1940_s1 = sld [smem:[#allocation20_spill]] }
  0x17   : > { %1939 = sst [smem:[#allocation18_spill]] %s1556_s6  ;;  %s258_s11 = scalar_lea.vmem [#allocation7], %s1101_s30 }
  0x18   : > { %s265_s12 = sshll.u32 %s258_s11, 4  ;;  %s1562_s13 = scalar_lea.sflag [#allocation8], %s254_s29  ;;  %s266_s12 = int_to_ptr.vmem [resolvable:$true] %s265_s12 }
  0x19   : > { %p1930_p8 = pneg %p1549_p7  ;;  %s1272_s14 = scalar_lea.vmem %s266_s12, 64 }
  0x1a   : > { %p1273_p9 = scmp.ne.s32.totalorder %s266_s12, %s1272_s14  ;;  %s1448_s15 = smov [#allocation7]  }
  0x1b   : > { %s1277_s16 = sshll.u32 %s1448_s15, 4  ;;  %s1278_s16 = int_to_ptr.vmem [resolvable:$false] %s1277_s16 }
  0x1c   : > { %s263_s10 = scalar_lea.hbm %s1940_s1, %s1102_s7  ;;  %p1275_p10 = pnand %p1273_p9, %p1930_p8 }
  0x1d   : > { %s1279_s17 = scalar_lea.vmem %s1278_s16, 128  ;;  %p1280_p12 = scmp.lt.s32.totalorder %s266_s12, %s1278_s16 }
  0x1e   : > { %p1276_p11 = pneg %p1275_p10  ;;  %p1281_p13 = scmp.lt.s32.totalorder %s1279_s17, %s1272_s14 }
  0x20   : > { %p1282_p0 = por %p1281_p13, %p1280_p12 }
  0x22   : > { %p1283_p2 = pnand %p1282_p0, %p1276_p11 }
  0x24   : > { %1286 = shalt.err (!%p1283_p2)
}
  0x25   : > { %1162 = dma.hbm_to_vmem [thread:$0]  (!%p1549_p7), %s263_s10, 64, %s266_s12, %s1562_s13  }
  0x26   : > { %s1573_s25 = sadd.s32 4294967295, %s1446_s23   ;;  %s1093_s26 = sadd.s32 4294967294, %s1446_s23  }
  0x27   : > { %p59_p4 = scmp.ne.s32.totalorder %s1430_s19, %s1426_s18  ;;  %p1929_p5 = scmp.eq.s32.totalorder %s1573_s25, 0 }
  0x28   : > { %p186_p6 = scmp.eq.s32.totalorder %s1573_s25, 1  ;;  %p192_p9 = scmp.eq.s32.totalorder %s1093_s26, 1 }
  0x29   : > { %p1094_p10 = scmp.ge.s32.totalorder %s1446_s23, 1  ;;  %p1583_p11 = por %p1929_p5, %p59_p4 }
  0x2a   : > { %p1590_p12 = por %p186_p6, %p53_p1  ;;  %p1594_p13 = por %p192_p9, %p59_p4 }
  0x2b   : > { %p199_p0 = scmp.lt.s32.totalorder %s1446_s23, 3  ;;  %s1944_s4 = sld [smem:[#allocation21_spill]] }
  0x2c   : > { %s1098_s12 = sshll.u32 %s1547_s27, 5  ;;  %s1137_s14 = sshll.u32 %s1442_s22, 9 }
  0x2d   : > { %p1602_p2 = pnand %p1094_p10, %p199_p0  ;;  %s1947_s0 = sld [smem:[#allocation19_spill]] }
  0x2e   : > { %s235_s8 = scalar_lea.vmem [#allocation3], %s1098_s12 }
  0x2f   : > { %p1152_p1 = pneg %p1602_p2  ;;  %s244_s9 = sshll.u32 %s235_s8, 4  ;;  %s1621_s9 = int_to_ptr.vmem [resolvable:$true] %s244_s9 }
  0x31   : > { %s220_s10 = sshll.u32 %s1944_s4, 4  ;;  %p1612_p4 = pnand %p1152_p1, %p1929_p5  ;;  %s221_s10 = int_to_ptr.vmem [resolvable:$true] %s220_s10 }
  0x32   : > { %s1287_s1 = scalar_lea.vmem %s221_s10, 64  ;;  %p1295_p1 = scmp.lt.s32.totalorder %s221_s10, %s221_s10 }
  0x33   : > { %s1619_s26 = scalar_lea.hbm %s1947_s0, %s1137_s14  ;;  %p1288_p6 = scmp.ne.s32.totalorder %s221_s10, %s1287_s1 }
  0x34   : > { %p1289_p9 = pneg %p1612_p4  ;;  %p1296_p3 = scmp.lt.s32.totalorder %s1287_s1, %s1287_s1 }
  0x36   : > { %p1290_p10 = pnand %p1289_p9, %p1288_p6  ;;  %p1297_p5 = por %p1296_p3, %p1295_p1 }
  0x38   : > { %p1291_p0 = pneg %p1290_p10 }
  0x3a   : > { %p1298_p8 = pnand %p1297_p5, %p1291_p0 }
  0x3c   : > { %1301 = shalt.err (!%p1298_p8)
}
  0x3d   : > { %s1449_s4 = smov [#allocation10]   ;;  %s1103_s12 = sshll.u32 %s1547_s27, 3 }
  0x3e   : > { %1155 = dma.vmem_to_smem (!%p1612_p4), %s221_s10, 64, %s1449_s4, [#allocation6]  }
  0x3f   : > { %s232_s14 = scalar_lea.sflag [#allocation4], %s1547_s27  ;;  %s1315_s16 = scalar_lea.vmem %s1621_s9, 512 }
  0x40   : > { %p1316_p6 = scmp.ne.s32.totalorder %s1621_s9, %s1315_s16  ;;  %p1948_p9 = pneg %p1549_p7 }
  0x41   : > { %s1450_s1 = smov [#allocation3]  }
  0x42   : > { %p1318_p10 = pnand %p1316_p6, %p1948_p9  ;;  %s1320_s17 = sshll.u32 %s1450_s1, 4  ;;  %s1321_s17 = int_to_ptr.vmem [resolvable:$false] %s1320_s17 }
  0x43   : > { %s1322_s8 = scalar_lea.vmem %s1321_s17, 1024  ;;  %p1323_p8 = scmp.lt.s32.totalorder %s1621_s9, %s1321_s17 }
  0x44   : > { %p1319_p3 = pneg %p1318_p10  ;;  %p1324_p5 = scmp.lt.s32.totalorder %s1322_s8, %s1315_s16 }
  0x46   : > { %p1325_p0 = por %p1324_p5, %p1323_p8 }
  0x48   : > { %p1326_p1 = pnand %p1325_p0, %p1319_p3 }
  0x4a   : > { %1329 = shalt.err (!%p1326_p1)
}
  0x4b   : > { %s1451_s15 = smov 256   ;;  %s1452_s4 = smov 16  }
  0x4c   : > { %1159 = dma.hbm_to_vmem [thread:$0]  (!%p1549_p7), %s1619_s26, 512, %s1621_s9, %s232_s14, %s1451_s15, %s1451_s15, %s1452_s4  }
  0x4d   : > { %s1138_s27 = sshll.u32 %s1442_s22, 7  ;;  %s276_s24 = scalar_lea.vmem [#allocation9], %s1103_s12 }
  0x4e   : > { %s284_s1 = scalar_lea.hbm %s1926_s3, %s1138_s27  ;;  %s286_s17 = sshll.u32 %s276_s24, 4  ;;  %s287_s17 = int_to_ptr.vmem [resolvable:$true] %s286_s17 }
  0x4f   : > { %s1343_s16 = scalar_lea.vmem %s287_s17, 128  ;;  %p1949_p6 = pmov %p1948_p9 }
  0x50   : > { %p1344_p4 = scmp.ne.s32.totalorder %s287_s17, %s1343_s16  ;;  %s1453_s8 = smov [#allocation9]  }
  0x51   : > { %s1348_s6 = sshll.u32 %s1453_s8, 4  ;;  %s1349_s6 = int_to_ptr.vmem [resolvable:$false] %s1348_s6 }
  0x52   : > { %p1346_p9 = pnand %p1344_p4, %p1949_p6  ;;  %s1350_s20 = scalar_lea.vmem %s1349_s6, 256 }
  0x53   : > { %p1351_p3 = scmp.lt.s32.totalorder %s287_s17, %s1349_s6  ;;  %p1352_p8 = scmp.lt.s32.totalorder %s1350_s20, %s1343_s16 }
  0x54   : > { %p1347_p10 = pneg %p1346_p9 }
  0x55   : > { %p1353_p5 = por %p1352_p8, %p1351_p3 }
  0x57   : > { %p1354_p0 = pnand %p1353_p5, %p1347_p10 }
  0x59   : > { %1357 = shalt.err (!%p1354_p0)
}
  0x5a   : > { %1165 = dma.hbm_to_vmem [thread:$0]  (!%p1549_p7), %s284_s1, 128, %s287_s17, %s1562_s13  }
  0x5b   : > { %295 = sbr.rel (%p1602_p2) target bundleno = 356 (0x164), region = 40  ;;  %s1652_s0 = sand.u32 (!%p1602_p2), 1, %s1430_s19  }
  0x5c   : > { %s1107_s24 = sshll.u32 (!%p1602_p2), %s1652_s0, 5  ;;  %s298_s26 = scalar_lea.sflag (!%p1602_p2), [#allocation4], %s1652_s0 }
  0x5d   : > { %s1656_s6 = scalar_lea.vmem (!%p1602_p2), [#allocation3], %s1107_s24 }
  0x60   : > { %1409 = dma.done.wait (%p1583_p11), %s298_s26, 512  }
  0x61   : > { %1411 = vsyncadd (%p1583_p11), %s298_s26, 4294966784  ;;  %s306_s20 = sand.u32 1, %s1573_s25   ;;  %s1108_s28 = sshll.u32 %s1652_s0, 2 }
  0x62   : > { %s307_s13 = scalar_lea.sflag [#allocation8], %s306_s20  ;;  %s1664_s11 = scalar_lea.vmem [#allocation7], %s1108_s28 }
  0x63   : > { %1413 = dma.done.wait (%p1583_p11), %s307_s13, 192  }
  0x64   : > { %1415 = vsyncadd (%p1583_p11), %s307_s13, 4294967104  ;;  %s1109_s9 = sshll.u32 %s1652_s0, 3  ;;  %p1950_p7 = scmp.eq.s32.totalorder %s1573_s25, 0 }
  0x65   : > { %s1671_s12 = scalar_lea.vmem [#allocation9], %s1109_s9 }
  0x66   : > { %1417 = dma.done.wait (%p1950_p7), [#allocation6], 64   ;;  %p1951_p2 = pmov %p1950_p7 }
  0x68   : > { %1419 = vsyncadd (%p1951_p2), [#allocation6], 4294967232 }
  0x69   : > { %328 = sfence }
  0x6a   : > { %s1677_s14 = scalar_lea.vmem [#allocation11], %s1109_s9  ;;  %p1112_p1 = scmp.ne.s32.totalorder %s1438_s21, 0 }
  0x6c   : > { %376 = sbr.rel (%p1112_p1) target bundleno = 125 (0x7d), region = 60 }
  0x71   : > { %v378_v0 = vlaneseq  ;;  %v377_v2 = vld [vmem:[%s1925_s2] sm:$0x3]  ;;  %v1454_v8 = vmov 0.0  }
  0x73   : > { %v379_v1 = vshrl.u32 %v378_v0, 7 }
  0x75   : > { %v383_v3 = vsub.s32 0, %v379_v1  ;;  %v387_v4 = vsub.s32 1, %v379_v1  ;;  %v380_v5 = vadd.s32 8, %v379_v1 }
  0x77   : > { %v384_v6 = vrot.slane %v377_v2, %v383_v3  ;;  %v388_v7 = vrot.slane %v377_v2, %v387_v4 }
  0x79   : > { %vm389_vm0 = vcmp.eq.s32.totalorder %v384_v6, %v379_v1  ;;  %vm390_vm1 = vcmp.eq.s32.totalorder %v388_v7, %v379_v1  ;;  %vm391_vm2 = vcmp.eq.s32.totalorder %v384_v6, %v380_v5  ;;  %vm392_vm3 = vcmp.eq.s32.totalorder %v388_v7, %v380_v5 }
  0x7a   : > { %v1113_v9 = vsel %vm389_vm0, 1.0, %v1454_v8  ;;  %v1114_v10 = vsel %vm390_vm1, 1.0, %v1454_v8  ;;  %v1115_v11 = vsel %vm391_vm2, 1.0, %v1454_v8  ;;  %v1116_v12 = vsel %vm392_vm3, 1.0, %v1454_v8 }
  0x7b   : > { %401 = vst [vmem:[#allocation2 + $0x10] sm:$0xff] %v1113_v9  ;;  %402 = vst [vmem:[#allocation2] sm:$0xff] %v1114_v10 }
  0x7c   : > { %403 = vst [vmem:[#allocation2 + $0x18] sm:$0xff] %v1115_v11  ;;  %404 = vst [vmem:[#allocation2 + $0x8] sm:$0xff] %v1116_v12 }
  0x7d PF: > { %v409_v13 = vld [vmem:[%s1664_s11] sm:$0xf]  ;;  %v1455_v14 = vmov 2   ;;  %v1456_v15 = vmov 0   ;;  %v1457_v16 = vmov 3   ;;  %v1458_v17 = vmov 1  }
  0x7e   : > { %1244 = vset.pattern.permute.xlu1 %v1455_v14  ;;  %1242 = vset.pattern.permute.xlu0 %v1456_v15  ;;  %v1459_v18 = vmov 4   ;;  %v1460_v19 = vmov 5   ;;  %v1461_v20 = vmov 6   ;;  %v1462_v21 = vmov 8   ;;  %s1768_s25 = sld [smem:[#allocation10]]  ;;  %s1139_s29 = sshll.u32 %s1438_s21, 7 }
  0x7f   : > { %442 = vperm.xlu1 %1244, %v409_v13   ;;  %412 = vperm.xlu0 %1242, %v409_v13   ;;  %v1463_v22 = vmov 7   ;;  %v1464_v23 = vmov 11   ;;  %v1465_v24 = vmov 9   ;;  %v1466_v25 = vmov 14   ;;  %s1770_s4 = sld [smem:[#allocation10 + $0x1]]  ;;  %s938_s15 = sshll.u32 %s1677_s14, 4  ;;  %s939_s15 = int_to_ptr.vmem [resolvable:$true] %s938_s15 }
  0x80   : > { %v1467_v26 = vmov 10   ;;  %v1468_v27 = vmov 15   ;;  %v1469_v28 = vmov 12   ;;  %v1470_v29 = vmov 13   ;;  %s1772_s27 = sld [smem:[#allocation10 + $0x2]] }
  0x81   : > { %v415_v30 = vlaneseq  ;;  %s1778_s10 = sld [smem:[#allocation10 + $0x3]]  ;;  %vm905_vm4 = vcmask 1040384   ;;  %vm908_vm5 = vcmask 1041408   ;;  %vm911_vm6 = vcmask 1042432  }
  0x82   : > { %v1688_v34 = vld [vmem:[#allocation2 + $0x10] sm:$0xff]  ;;  %v1690_v35 = vld [vmem:[#allocation2] sm:$0xff]  ;;  %s1780_s1 = sld [smem:[#allocation10 + $0x80]] }
  0x83   : > { %1245 = vset.pattern.permute.xlu1 %v1457_v16  ;;  %1243 = vset.pattern.permute.xlu0 %v1458_v17  ;;  %v416_v31 = vshrl.u32 %v415_v30, 7  ;;  %s1782_s17 = sld [smem:[#allocation10 + $0x81]] }
  0x84   : > { %458 = vperm.xlu1 %1245, %v409_v13   ;;  %426 = vperm.xlu0 %1243, %v409_v13   ;;  %s1784_s16 = sld [smem:[#allocation10 + $0x82]] }
  0x85   : > { %v1684_v32 = vsub.s32 0, %v416_v31  ;;  %v1686_v33 = vsub.s32 1, %v416_v31  ;;  %v1692_v36 = vsub.s32 2, %v416_v31  ;;  %v1698_v41 = vsub.s32 3, %v416_v31  ;;  %s1786_s8 = sld [smem:[#allocation10 + $0x83]] }
  0x86   : > { %v1704_v44 = vsub.s32 4, %v416_v31  ;;  %v1710_v51 = vsub.s32 5, %v416_v31  ;;  %v1724_v0 = vsub.s32 6, %v416_v31  ;;  %v1726_v11 = vsub.s32 7, %v416_v31  ;;  %s1788_s24 = sld [smem:[#allocation10 + $0x100]] }
  0x87   : > { %v418_v39 = vrot.slane %v1688_v34, %v1684_v32  ;;  %v422_v40 = vrot.slane %v1690_v35, %v1684_v32  ;;  %v432_v42 = vrot.slane %v1688_v34, %v1686_v33  ;;  %v436_v43 = vrot.slane %v1690_v35, %v1686_v33  ;;  %s1790_s26 = sld [smem:[#allocation10 + $0x101]] }
  0x88   : > { %1246 = vset.pattern.permute.xlu1 %v1459_v18  ;;  %1247 = vset.pattern.permute.xlu0 %v1460_v19  ;;  %v448_v45 = vrot.slane %v1688_v34, %v1692_v36  ;;  %v452_v46 = vrot.slane %v1690_v35, %v1692_v36  ;;  %v464_v52 = vrot.slane %v1688_v34, %v1698_v41  ;;  %s1794_s20 = sld [smem:[#allocation10 + $0x102]] }
  0x89   : > { %474 = vperm.xlu1 %1246, %v409_v13   ;;  %490 = vperm.xlu0 %1247, %v409_v13   ;;  %v468_v53 = vrot.slane %v1690_v35, %v1698_v41  ;;  %v480_v56 = vrot.slane %v1688_v34, %v1704_v44  ;;  %v484_v57 = vrot.slane %v1690_v35, %v1704_v44  ;;  %s1800_s28 = sld [smem:[#allocation10 + $0x103]] }
  0x8a   : > { %v496_v62 = vrot.slane %v1688_v34, %v1710_v51  ;;  %v500_v63 = vrot.slane %v1690_v35, %v1710_v51  ;;  %v512_v14 = vrot.slane %v1688_v34, %v1724_v0  ;;  %v516_v15 = vrot.slane %v1690_v35, %v1724_v0  ;;  %s1806_s13 = sld [smem:[#allocation10 + $0x180]] }
  0x8b   : > { %v528_v19 = vrot.slane %v1688_v34, %v1726_v11  ;;  %s1810_s11 = sld [smem:[#allocation10 + $0x181]] }
  0x8c   : > { %s1814_s9 = sld [smem:[#allocation10 + $0x183]] }
  0x8d   : > { %1248 = vset.pattern.permute.xlu1 %v1461_v20  ;;  %1250 = vset.pattern.permute.xlu0 %v1462_v21  ;;  %v532_v20 = vrot.slane %v1690_v35, %v1726_v11  ;;  %v1736_v21 = vld [vmem:[#allocation2 + $0x18] sm:$0xff] }
  0x8e   : > { %506 = vperm.xlu1 %1248, %v409_v13   ;;  %538 = vperm.xlu0 %1250, %v409_v13  }
  0x92   : > { %1249 = vset.pattern.permute.xlu1 %v1463_v22  ;;  %1253 = vset.pattern.permute.xlu0 %v1464_v23  ;;  %v1738_v22 = vld [vmem:[#allocation2 + $0x8] sm:$0xff] }
  0x93   : > { %522 = vperm.xlu1 %1249, %v409_v13   ;;  %586 = vperm.xlu0 %1253, %v409_v13  }
  0x97   : > { %1251 = vset.pattern.permute.xlu1 %v1465_v24  ;;  %1256 = vset.pattern.permute.xlu0 %v1466_v25 }
  0x98   : > { %554 = vperm.xlu1 %1251, %v409_v13   ;;  %634 = vperm.xlu0 %1256, %v409_v13  }
  0x9c   : > { %1252 = vset.pattern.permute.xlu1 %v1467_v26  ;;  %1258 = vset.pattern.permute.xlu0 %v1468_v27 }
  0x9d   : > { %570 = vperm.xlu1 %1252, %v409_v13  }
  0xa1   : > { %1254 = vset.pattern.permute.xlu1 %v1469_v28  ;;  %v548_v28 = vrot.slane %v1738_v22, %v1684_v32 }
  0xa2   : > { %602 = vperm.xlu1 %1254, %v409_v13  }
  0xa6   : > { %1255 = vset.pattern.permute.xlu1 %v1470_v29 }
  0xa7   : > { %618 = vperm.xlu1 %1255, %v409_v13  }
  0xab   : > { %1257 = vset.pattern.permute.xlu1 %v1468_v27  ;;  %v544_v27 = vrot.slane %v1736_v21, %v1684_v32 }
  0xac   : > { %650 = vperm.xlu1 %1257, %v409_v13  }
  0xfa   : > { %v443_v37 = vpop.permute.xlu1 %442  ;;  %v413_v38 = vpop.permute.xlu0 %412 }
  0xfb   : > { %v423_v47 = vmul.f32 %v418_v39, %v413_v38  ;;  %v424_v48 = vmul.f32 %v422_v40, %v413_v38  ;;  %v453_v58 = vmul.f32 %v448_v45, %v443_v37  ;;  %v454_v59 = vmul.f32 %v452_v46, %v443_v37 }
  0xfc   : > { %v560_v38 = vrot.slane %v1736_v21, %v1686_v33  ;;  %v564_v39 = vrot.slane %v1738_v22, %v1686_v33 }
  0xff   : > { %v459_v49 = vpop.permute.xlu1 %458  ;;  %v427_v50 = vpop.permute.xlu0 %426 }
 0x100   : > { %v437_v54 = vmul.f32 %v432_v42, %v427_v50  ;;  %v438_v55 = vmul.f32 %v436_v43, %v427_v50  ;;  %v469_v1 = vmul.f32 %v464_v52, %v459_v49  ;;  %v470_v2 = vmul.f32 %v468_v53, %v459_v49 }
 0x102   : > { %v439_v60 = vadd.f32 %v437_v54, %v423_v47  ;;  %v440_v61 = vadd.f32 %v438_v55, %v424_v48  ;;  %v576_v47 = vrot.slane %v1736_v21, %v1692_v36  ;;  %v580_v48 = vrot.slane %v1738_v22, %v1692_v36 }
 0x103   : > { %v592_v54 = vrot.slane %v1736_v21, %v1698_v41  ;;  %v596_v55 = vrot.slane %v1738_v22, %v1698_v41 }
 0x104   : > { %v455_v3 = vadd.f32 %v453_v58, %v439_v60  ;;  %v456_v4 = vadd.f32 %v454_v59, %v440_v61  ;;  %v475_v5 = vpop.permute.xlu1 %474  ;;  %v491_v6 = vpop.permute.xlu0 %490 }
 0x105   : > { %v485_v7 = vmul.f32 %v480_v56, %v475_v5  ;;  %v486_v8 = vmul.f32 %v484_v57, %v475_v5  ;;  %v501_v12 = vmul.f32 %v496_v62, %v491_v6  ;;  %v502_v13 = vmul.f32 %v500_v63, %v491_v6 }
 0x106   : > { %v471_v9 = vadd.f32 %v469_v1, %v455_v3  ;;  %v472_v10 = vadd.f32 %v470_v2, %v456_v4  ;;  %v608_v62 = vrot.slane %v1736_v21, %v1704_v44  ;;  %v612_v63 = vrot.slane %v1738_v22, %v1704_v44 }
 0x107   : > { %v624_v6 = vrot.slane %v1736_v21, %v1710_v51 }
 0x108   : > { %v487_v16 = vadd.f32 %v485_v7, %v471_v9  ;;  %v488_v17 = vadd.f32 %v486_v8, %v472_v10  ;;  %v628_v7 = vrot.slane %v1738_v22, %v1710_v51  ;;  %v640_v8 = vrot.slane %v1736_v21, %v1724_v0 }
 0x109   : > { %v507_v18 = vpop.permute.xlu1 %506  ;;  %v539_v30 = vpop.permute.xlu0 %538  ;;  %v644_v9 = vrot.slane %v1738_v22, %v1724_v0  ;;  %v656_v0 = vrot.slane %v1736_v21, %v1726_v11 }
 0x10a   : > { %v503_v23 = vadd.f32 %v501_v12, %v487_v16  ;;  %v504_v24 = vadd.f32 %v502_v13, %v488_v17  ;;  %v517_v25 = vmul.f32 %v512_v14, %v507_v18  ;;  %v518_v26 = vmul.f32 %v516_v15, %v507_v18 }
 0x10b   : > { %v549_v43 = vmul.f32 %v544_v27, %v539_v30  ;;  %v550_v45 = vmul.f32 %v548_v28, %v539_v30  ;;  %v665_v30 = vld [vmem:[%s1656_s6] sm:$0xff] }
 0x10c   : > { %v519_v31 = vadd.f32 %v517_v25, %v503_v23  ;;  %v520_v34 = vadd.f32 %v518_v26, %v504_v24  ;;  %v660_v23 = vrot.slane %v1738_v22, %v1726_v11 }
 0x10e   : > { %v523_v29 = vpop.permute.xlu1 %522  ;;  %v587_v57 = vpop.permute.xlu0 %586 }
 0x10f   : > { %v533_v37 = vmul.f32 %v528_v19, %v523_v29  ;;  %v534_v35 = vmul.f32 %v532_v20, %v523_v29  ;;  %v597_v3 = vmul.f32 %v592_v54, %v587_v57  ;;  %v598_v4 = vmul.f32 %v596_v55, %v587_v57 }
 0x110   : > { %v732_v57 = vstv %s1770_s4 }
 0x111   : > { %v535_v40 = vadd.f32 %v533_v37, %v519_v31  ;;  %v536_v42 = vadd.f32 %v534_v35, %v520_v34  ;;  %v666_v31 = vld [vmem:[%s1656_s6 + $0x8] sm:$0xff] }
 0x113   : > { %v555_v46 = vpop.permute.xlu1 %554  ;;  %v551_v49 = vadd.f32 %v549_v43, %v535_v40  ;;  %v552_v50 = vadd.f32 %v550_v45, %v536_v42  ;;  %v635_v14 = vpop.permute.xlu0 %634  ;;  %v668_v40 = vld [vmem:[%s1656_s6 + $0x18] sm:$0xff] }
 0x114   : > { %v565_v52 = vmul.f32 %v560_v38, %v555_v46  ;;  %v566_v53 = vmul.f32 %v564_v39, %v555_v46  ;;  %v645_v16 = vmul.f32 %v640_v8, %v635_v14  ;;  %v646_v17 = vmul.f32 %v644_v9, %v635_v14  ;;  %v667_v39 = vld [vmem:[%s1656_s6 + $0x10] sm:$0xff]  ;;  %s1812_s6 = sld [smem:[#allocation10 + $0x182]] }
 0x115   : > { %v812_v8 = vstv %s1790_s26  ;;  %v824_v9 = vstv %s1794_s20 }
 0x116   : > { %v567_v58 = vadd.f32 %v565_v52, %v551_v49  ;;  %v568_v59 = vadd.f32 %v566_v53, %v552_v50 }
 0x118   : > { %v571_v56 = vpop.permute.xlu1 %570 }
 0x119   : > { %v581_v60 = vmul.f32 %v576_v47, %v571_v56  ;;  %v582_v61 = vmul.f32 %v580_v48, %v571_v56  ;;  %v728_v56 = vstv %s1768_s25 }
 0x11b   : > { %v583_v1 = vadd.f32 %v581_v60, %v567_v58  ;;  %v584_v2 = vadd.f32 %v582_v61, %v568_v59  ;;  %v744_v58 = vstv %s1772_s27  ;;  %v756_v59 = vstv %s1778_s10  ;;  %s936_s27 = scalar_lea.hbm %s1928_s5, %s1139_s29  ;;  %s922_s10 = scalar_lea.sflag [#allocation5], %s1652_s0 }
 0x11d   : > { %v603_v5 = vpop.permute.xlu1 %602  ;;  %v599_v10 = vadd.f32 %v597_v3, %v583_v1  ;;  %v600_v12 = vadd.f32 %v598_v4, %v584_v2  ;;  %v768_v1 = vstv %s1780_s1  ;;  %v772_v2 = vstv %s1782_s17  ;;  %s1358_s1 = scalar_lea.vmem %s939_s15, 128  ;;  %s1471_s17 = smov [#allocation11]  }
 0x11e   : > { %v613_v44 = vmul.f32 %v608_v62, %v603_v5  ;;  %v614_v13 = vmul.f32 %v612_v63, %v603_v5  ;;  %v784_v3 = vstv %s1784_s16  ;;  %v796_v4 = vstv %s1786_s8  ;;  %p1359_p11 = scmp.ne.s32.totalorder %s939_s15, %s1358_s1  ;;  %s1362_s16 = sshll.u32 %s1471_s17, 4  ;;  %s1363_s16 = int_to_ptr.vmem [resolvable:$false] %s1362_s16 }
 0x11f   : > { %p1365_p9 = scmp.lt.s32.totalorder %s939_s15, %s1363_s16 }
 0x120   : > { %v615_v18 = vadd.f32 %v613_v44, %v599_v10  ;;  %v616_v51 = vadd.f32 %v614_v13, %v600_v12  ;;  %v836_v10 = vstv %s1800_s28  ;;  %v848_v12 = vstv %s1806_s13  ;;  %p1360_p4 = pnand %p1359_p11, %p1590_p12 }
 0x121   : > { %v852_v44 = vstv %s1810_s11 }
 0x122   : > { %v619_v15 = vpop.permute.xlu1 %618  ;;  %p1361_p6 = pneg %p1360_p4 }
 0x123   : > { %v629_v19 = vmul.f32 %v624_v6, %v619_v15  ;;  %v630_v20 = vmul.f32 %v628_v7, %v619_v15  ;;  %v808_v7 = vstv %s1788_s24  ;;  %v864_v15 = vstv %s1812_s6 }
 0x125   : > { %v631_v24 = vadd.f32 %v629_v19, %v615_v18  ;;  %v632_v25 = vadd.f32 %v630_v20, %v616_v51 }
 0x127   : > { %v647_v26 = vadd.f32 %v645_v16, %v631_v24  ;;  %v648_v27 = vadd.f32 %v646_v17, %v632_v25  ;;  %v651_v28 = vpop.permute.xlu1 %650  ;;  %v876_v16 = vstv %s1814_s9 }
 0x128   : > { %v661_v21 = vmul.f32 %v656_v0, %v651_v28  ;;  %v662_v29 = vmul.f32 %v660_v23, %v651_v28 }
 0x12a   : > { %v663_v11 = vadd.f32 %v661_v21, %v647_v26  ;;  %v664_v22 = vadd.f32 %v662_v29, %v648_v27 }
 0x12c   : > { %v672_v34 = vrot.slane %v663_v11, %v1684_v32  ;;  %v676_v37 = vrot.slane %v664_v22, %v1684_v32  ;;  %v682_v35 = vrot.slane %v663_v11, %v1686_v33  ;;  %v686_v38 = vrot.slane %v664_v22, %v1686_v33 }
 0x12d   : > { %v712_v42 = vrot.slane %v663_v11, %v1698_v41  ;;  %v716_v43 = vrot.slane %v664_v22, %v1698_v41  ;;  %v700_v47 = vrot.slane %v663_v11, %v1692_v36  ;;  %v704_v32 = vrot.slane %v664_v22, %v1692_v36 }
 0x12e   : > { %v687_v45 = vmul.f32 %v682_v35, %v665_v30  ;;  %v688_v46 = vmul.f32 %v686_v38, %v666_v31  ;;  %v677_v33 = vmul.f32 %v672_v34, %v665_v30  ;;  %v678_v48 = vmul.f32 %v676_v37, %v666_v31 }
 0x12f   : > { %v717_v50 = vmul.f32 %v712_v42, %v667_v39  ;;  %v718_v52 = vmul.f32 %v716_v43, %v668_v40  ;;  %v705_v54 = vmul.f32 %v700_v47, %v667_v39  ;;  %v706_v55 = vmul.f32 %v704_v32, %v668_v40 }
 0x130   : > { %v691_v49 = vrot.slane %v687_v45, 4  ;;  %v692_v41 = vrot.slane %v688_v46, 4 }
 0x131   : > { %v721_v62 = vrot.slane %v717_v50, 4  ;;  %v722_v63 = vrot.slane %v718_v52, 4 }
 0x132   : > { %v695_v53 = vadd.f32 %v691_v49, %v677_v33  ;;  %v696_v36 = vadd.f32 %v692_v41, %v678_v48 }
 0x134   : > { %v707_v60 = vadd.f32 %v705_v54, %v695_v53  ;;  %v708_v61 = vadd.f32 %v706_v55, %v696_v36 }
 0x136   : > { %v1824_v5 = vadd.f32 %v721_v62, %v707_v60  ;;  %v1826_v6 = vadd.f32 %v722_v63, %v708_v61 }
 0x138   : > { %v733_v13 = vmul.f32 %v732_v57, %v1824_v5  ;;  %v734_v14 = vmul.f32 %v732_v57, %v1826_v6  ;;  %v729_v17 = vmul.f32 %v728_v56, %v1824_v5  ;;  %v730_v18 = vmul.f32 %v728_v56, %v1826_v6 }
 0x139   : > { %v745_v51 = vmul.f32 %v744_v58, %v1824_v5  ;;  %v746_v19 = vmul.f32 %v744_v58, %v1826_v6  ;;  %v757_v23 = vmul.f32 %v756_v59, %v1824_v5  ;;  %v758_v24 = vmul.f32 %v756_v59, %v1826_v6 }
 0x13a   : > { %v737_v20 = vrot.slane %v733_v13, 1  ;;  %v738_v0 = vrot.slane %v734_v14, 1  ;;  %v769_v27 = vmul.f32 %v768_v1, %v1824_v5  ;;  %v770_v28 = vmul.f32 %v768_v1, %v1826_v6 }
 0x13b   : > { %v749_v25 = vrot.slane %v745_v51, 2  ;;  %v750_v26 = vrot.slane %v746_v19, 2  ;;  %v773_v11 = vmul.f32 %v772_v2, %v1824_v5  ;;  %v774_v22 = vmul.f32 %v772_v2, %v1826_v6 }
 0x13c   : > { %v741_v21 = vadd.f32 %v737_v20, %v729_v17  ;;  %v742_v29 = vadd.f32 %v738_v0, %v730_v18  ;;  %v785_v30 = vmul.f32 %v784_v3, %v1824_v5  ;;  %v786_v31 = vmul.f32 %v784_v3, %v1826_v6 }
 0x13d   : > { %v797_v34 = vmul.f32 %v796_v4, %v1824_v5  ;;  %v798_v37 = vmul.f32 %v796_v4, %v1826_v6  ;;  %v761_v35 = vrot.slane %v757_v23, 3  ;;  %v762_v38 = vrot.slane %v758_v24, 3 }
 0x13e   : > { %v777_v39 = vrot.slane %v773_v11, 1  ;;  %v778_v40 = vrot.slane %v774_v22, 1  ;;  %v753_v42 = vadd.f32 %v749_v25, %v741_v21  ;;  %v754_v43 = vadd.f32 %v750_v26, %v742_v29 }
 0x13f   : > { %v789_v45 = vrot.slane %v785_v30, 2  ;;  %v790_v46 = vrot.slane %v786_v31, 2  ;;  %v801_v33 = vrot.slane %v797_v34, 3  ;;  %v802_v48 = vrot.slane %v798_v37, 3 }
 0x140   : > { %v781_v47 = vadd.f32 %v777_v39, %v769_v27  ;;  %v782_v32 = vadd.f32 %v778_v40, %v770_v28  ;;  %v809_v49 = vmul.f32 %v808_v7, %v1824_v5  ;;  %v810_v41 = vmul.f32 %v808_v7, %v1826_v6 }
 0x141   : > { %v813_v50 = vmul.f32 %v812_v8, %v1824_v5  ;;  %v814_v52 = vmul.f32 %v812_v8, %v1826_v6  ;;  %v825_v54 = vmul.f32 %v824_v9, %v1824_v5  ;;  %v826_v55 = vmul.f32 %v824_v9, %v1826_v6 }
 0x142   : > { %v793_v53 = vadd.f32 %v789_v45, %v781_v47  ;;  %v794_v36 = vadd.f32 %v790_v46, %v782_v32  ;;  %v837_v58 = vmul.f32 %v836_v10, %v1824_v5  ;;  %v838_v59 = vmul.f32 %v836_v10, %v1826_v6  ;;  %v914_v45 = vld [vmem:[%s1671_s12] sm:$0xff]  ;;  %s1364_s12 = scalar_lea.vmem %s1363_s16, 256 }
 0x143   : > { %v817_v56 = vrot.slane %v813_v50, 1  ;;  %v818_v57 = vrot.slane %v814_v52, 1  ;;  %v829_v62 = vrot.slane %v825_v54, 2  ;;  %v830_v63 = vrot.slane %v826_v55, 2  ;;  %p1366_p10 = scmp.lt.s32.totalorder %s1364_s12, %s1358_s1 }
 0x144   : > { %v805_v60 = vadd.f32 %v801_v33, %v793_v53  ;;  %v806_v61 = vadd.f32 %v802_v48, %v794_v36  ;;  %v841_v3 = vrot.slane %v837_v58, 3  ;;  %v842_v4 = vrot.slane %v838_v59, 3 }
 0x145   : > { %v821_v1 = vadd.f32 %v817_v56, %v809_v49  ;;  %v822_v2 = vadd.f32 %v818_v57, %v810_v41  ;;  %v849_v7 = vmul.f32 %v848_v12, %v1824_v5  ;;  %v850_v8 = vmul.f32 %v848_v12, %v1826_v6  ;;  %p1367_p3 = por %p1366_p10, %p1365_p9 }
 0x146   : > { %v853_v9 = vmul.f32 %v852_v44, %v1824_v5  ;;  %v854_v10 = vmul.f32 %v852_v44, %v1826_v6  ;;  %v865_v17 = vmul.f32 %v864_v15, %v1824_v5  ;;  %v866_v18 = vmul.f32 %v864_v15, %v1826_v6 }
 0x147   : > { %v833_v13 = vadd.f32 %v829_v62, %v821_v1  ;;  %v834_v14 = vadd.f32 %v830_v63, %v822_v2  ;;  %v877_v20 = vmul.f32 %v876_v16, %v1824_v5  ;;  %v878_v12 = vmul.f32 %v876_v16, %v1826_v6  ;;  %p1368_p8 = pnand %p1367_p3, %p1361_p6 }
 0x148   : > { %v857_v51 = vrot.slane %v853_v9, 1  ;;  %v858_v19 = vrot.slane %v854_v10, 1  ;;  %v765_v0 = vadd.f32 %v761_v35, %v753_v42  ;;  %v766_v23 = vadd.f32 %v762_v38, %v754_v43 }
 0x149   : > { %v845_v24 = vadd.f32 %v841_v3, %v833_v13  ;;  %v846_v44 = vadd.f32 %v842_v4, %v834_v14  ;;  %v869_v27 = vrot.slane %v865_v17, 2  ;;  %v870_v28 = vrot.slane %v866_v18, 2 }
 0x14a   : > { %v861_v25 = vadd.f32 %v857_v51, %v849_v7  ;;  %v862_v26 = vadd.f32 %v858_v19, %v850_v8  ;;  %v889_v21 = vrot.slane %v805_v60, 7  ;;  %v890_v29 = vrot.slane %v806_v61, 7 }
 0x14b   : > { %v895_v11 = vrot.slane %v845_v24, 6  ;;  %v896_v15 = vrot.slane %v846_v44, 6  ;;  %v881_v5 = vrot.slane %v877_v20, 3  ;;  %v882_v31 = vrot.slane %v878_v12, 3 }
 0x14c   : > { %v873_v22 = vadd.f32 %v869_v27, %v861_v25  ;;  %v874_v30 = vadd.f32 %v870_v28, %v862_v26  ;;  %v906_v6 = vsel %vm905_vm4, %v765_v0, %v889_v21  ;;  %v907_v16 = vsel %vm905_vm4, %v766_v23, %v890_v29 }
 0x14d   : > { %v909_v35 = vsel %vm908_vm5, %v906_v6, %v895_v11  ;;  %v910_v38 = vsel %vm908_vm5, %v907_v16, %v896_v15 }
 0x14e   : > { %v885_v34 = vadd.f32 %v881_v5, %v873_v22  ;;  %v886_v37 = vadd.f32 %v882_v31, %v874_v30 }
 0x150   : > { %v901_v39 = vrot.slane %v885_v34, 5  ;;  %v902_v40 = vrot.slane %v886_v37, 5 }
 0x152   : > { %v912_v42 = vsel %vm911_vm6, %v909_v35, %v901_v39  ;;  %v913_v43 = vsel %vm911_vm6, %v910_v38, %v902_v40 }
 0x153   : > { %v917_v46 = vcombine.low %v912_v42, %v913_v43 }
 0x155   : > { %v919_v47 = vadd.f32 %v917_v46, %v914_v45 }
 0x157   : > { %920 = vst [vmem:[%s1677_s14] sm:$0xff] %v919_v47 }
 0x158   : > { %1371 = shalt.err (!%p1368_p8)
}
 0x159   : > { %s1372_s21 = scalar_lea.hbm %s936_s27, 128  ;;  %s1376_s8 = scalar_lea.hbm %s1928_s5, 256 }
 0x15a   : > { %p1373_p5 = scmp.ne.s32.totalorder %s936_s27, %s1372_s21  ;;  %p1377_p2 = scmp.lt.s32.totalorder %s936_s27, %s1928_s5 }
 0x15b   : > { %p1378_p1 = scmp.lt.s32.totalorder %s1376_s8, %s1372_s21 }
 0x15c   : > { %p1374_p0 = pnand %p1373_p5, %p1590_p12 }
 0x15d   : > { %p1379_p11 = por %p1378_p1, %p1377_p2 }
 0x15e   : > { %p1375_p7 = pneg %p1374_p0 }
 0x160   : > { %p1380_p4 = pnand %p1379_p11, %p1375_p7 }
 0x162   : > { %1383 = shalt.err (!%p1380_p4)
}
 0x163   : > { %1150 = dma.vmem_to_hbm [thread:$0]  (%p1590_p12), %s939_s15, 128, %s936_s27, %s922_s10  }
 0x164 PF: > { %s950_s20 = sand.u32 1, %s1426_s18   ;;  %p1952_p6 = scmp.ge.s32.totalorder %s1446_s23, 2 }
 0x165   : > { %s951_s28 = scalar_lea.sflag [#allocation5], %s950_s20 }
 0x166   : > { %p1167_p9 = pnand %p1952_p6, %p1594_p13 }
 0x168   : > { %p1168_p10 = pneg %p1167_p9 }
 0x16a   : > { %1421 = dma.done.wait (%p1168_p10), %s951_s28, 128  }
 0x16b   : > { %1423 = vsyncadd (%p1168_p10), %s951_s28, 4294967168  ;;  %s25_s23 = sadd.s32 1, %s1446_s23   ;;  %s1953_s13 = sld [smem:[#allocation16_spill]] }
 0x16c   : > { %p22_p3 = scmp.ge.s32.totalorder %s25_s23, 4   ;;  %s1954_s20 = sld [smem:[#allocation18_spill]] }
 0x16d   : > { %s1955_s30 = sld [smem:[#allocation17_spill]]  ;;  %s1956_s18 = smov %s1430_s19 }
 0x16e   : > { %s1958_s21 = smov %s1442_s22 }
 0x16f   :  { %24 = sbr.rel (!%p22_p3) target bundleno = 13 (0xd), region = 121 }
 0x171   : > { %s1957_s19 = smov %s1953_s13 }
 0x173   : > { %s1959_s22 = smov %s1955_s30 }
 0x174   :  { %956 = vsyncpa [#allocation4], 1 }
 0x175   :  { %958 = vsyncpa [#allocation4 + $0x1], 1 }
 0x176   :  { %959 = vsyncpa [#allocation8], 1 }
 0x177   :  { %961 = vsyncpa [#allocation8 + $0x1], 1 }
 0x178   :  { %962 = vsyncpa [#allocation5], 1 }
 0x179   :  { %964 = vsyncpa [#allocation5 + $0x1], 1 }
 0x17a   :  { %965 = vsyncpa [#allocation6], 1 }
 0x17b   :  { %967 = vsyncpa [#allocation6 + $0x1], 1 }

</bundles_post_ra>
